<compile_context>
chip_gen: v6e
topology: v6e:2x2x1
jax: 0.10.0
libtpu: 0.0.40
codegen_flags: <defaults>
</compile_context>

<pallas_src>
import functools
import math

import jax
import jax.numpy as jnp
from jax.experimental import pallas as pl
from jax.experimental.pallas import tpu as pltpu


def _margin_cosine_kernel(x_ref, w_ref, inv_xn_ref, lab_ref, o_ref, wn_ref,
                          *, s, sm, eps):
    # x_ref:      (TB, D)  native dtype
    # w_ref:      (TC, D)  native dtype (same HBM tile revisited for all i)
    # inv_xn_ref: (TB, 1)  f32, precomputed 1 / max(||x_b||, sqrt(eps))
    # lab_ref:    (TB, 1)  int32 (padded rows carry -1)
    # o_ref:      (TB, TC)
    # wn_ref:     (TC, D)  persistent scratch: s * w / max(||w_c||, sqrt(eps))
    j = pl.program_id(0)   # class-tile index (outer / slow axis)
    i = pl.program_id(1)   # batch-tile index (inner / fast axis)

    # Normalize the weight tile once per class tile; reused for every batch tile.
    @pl.when(i == 0)
    def _():
        wf = w_ref[...].astype(jnp.float32)
        wsq = jnp.sum(wf * wf, axis=1, keepdims=True)              # (TC, 1)
        inv_wn = s * jax.lax.rsqrt(jnp.maximum(wsq, eps))          # scale folded
        wn_ref[...] = (wf * inv_wn).astype(wn_ref.dtype)

    # Fold the row inverse-norm into x before the matmul (f32, then MXU dtype).
    xs = (x_ref[...].astype(jnp.float32) * inv_xn_ref[...]).astype(wn_ref.dtype)

    # MXU: contract the shared D axis directly (NT form, no weight relayout).
    logits = jax.lax.dot_general(
        xs, wn_ref[...],
        dimension_numbers=(((1,), (1,)), ((), ())),
        preferred_element_type=jnp.float32,
    )  # (TB, TC) == s * cosine

    # Fused one-hot margin: shift the label into this tile's local column range.
    lab_local = lab_ref[...] - j * o_ref.shape[1]                   # (TB, 1)
    col = jax.lax.broadcasted_iota(jnp.int32, logits.shape, 1)
    out = jnp.where(col == lab_local, logits - sm, logits)

    o_ref[...] = out.astype(o_ref.dtype)


def _round_up(n, k):
    return ((n + k - 1) // k) * k


def _vmem_capacity_bytes():
    try:
        cap = getattr(pltpu.get_tpu_info(), "vmem_capacity_bytes", None)
        if cap:
            return int(cap)
    except Exception:
        pass
    return 64 * 1024 * 1024  # v7x per-TC VMEM: the most conservative generation


def _vmem_estimate(tb, tc, D, xb, wb, ob, mb):
    # Double-buffered pipeline copies of every input/output block ...
    io = 2 * (tb * D * xb + tc * D * wb + tb * tc * ob + 2 * tb * 4)
    # ... plus the persistent normalized-weight scratch and transient f32 temps
    # (f32 weight tile during the norm pass, f32 matmul result, f32 scaled x).
    extra = tc * D * mb + tc * D * 4 + tb * tc * 4 + tb * D * 4
    return io + extra


def _choose_tiles(B, C, D, xb, wb, ob, mb, max_tb, max_tc):
    cap = _vmem_capacity_bytes()
    # Leave headroom under physical capacity for Mosaic internal scratch, and
    # budget the tiles at ~85% of the requested limit.
    vmem_limit = int(min(int(cap * 0.78), 100 * 1024 * 1024))
    budget = int(vmem_limit * 0.85)

    bp = _round_up(B, 8)
    cp = _round_up(C, 128)

    tb_cands = [t for t in (512, 256, 128, 64, 32, 16, 8)
                if t <= bp and t <= max_tb]
    if bp <= min(512, max_tb):
        tb_cands.insert(0, bp)             # exact fit avoids batch padding
    tb_cands = sorted(set(tb_cands), reverse=True) or [8]

    tc_cands = [c for c in (4096, 2048, 1024, 512, 256, 128)
                if c < cp and c <= max_tc]
    if cp <= min(4096, max_tc):
        tc_cands.insert(0, cp)             # exact fit avoids class padding
    tc_cands = sorted(set(tc_cands), reverse=True) or [128]

    for tb in tb_cands:                    # prefer the widest class tile first
        for tc in tc_cands:
            if _vmem_estimate(tb, tc, D, xb, wb, ob, mb) <= budget:
                return tb, tc, vmem_limit
    return tb_cands[-1], 128, vmem_limit   # smallest legal tiles as a fallback


def margin_cosine_product(x, weight, label, *, scale=32.0, m=0.1, eps=1e-8,
                          out_dtype=jnp.float32, mxu_dtype=None,
                          max_tb=256, max_tc=4096):
    """Pallas-backed forward of MarginCosineProduct: s*(cos(x, W) - onehot*m)."""
    B, D = x.shape
    C, D2 = weight.shape
    assert D == D2, "feature dims of x and weight must match"

    # MXU operand dtype: defaults to x's dtype (keeps f32 accuracy here).
    # Pass mxu_dtype=jnp.bfloat16 (and/or store weight in bf16) for native-rate
    # MXU and halved weight HBM traffic when the training recipe allows it.
    mxu_dtype = jnp.dtype(mxu_dtype) if mxu_dtype is not None else jnp.dtype(x.dtype)

    # Hoisted per-row inverse norms of x: one tiny pass, (B, 1) f32.
    xf32 = x.astype(jnp.float32)
    inv_xn = jax.lax.rsqrt(
        jnp.maximum(jnp.sum(xf32 * xf32, axis=1, keepdims=True), eps))
    # TODO(synk): labels could ride in SMEM via PrefetchScalarGridSpec; a tiny
    # (tb, 1) int32 VMEM block keeps lowering simple and costs ~nothing.
    label2d = label.reshape(B, 1).astype(jnp.int32)

    tb, tc, vmem_limit = _choose_tiles(
        B, C, D,
        jnp.dtype(x.dtype).itemsize, jnp.dtype(weight.dtype).itemsize,
        jnp.dtype(out_dtype).itemsize, mxu_dtype.itemsize,
        max_tb, max_tc)

    # Pad to tile multiples (zero rows/cols are inert and sliced off below).
    Bp = _round_up(B, tb)
    Cp = _round_up(C, tc)
    if Bp != B:
        pad = Bp - B
        x = jnp.pad(x, ((0, pad), (0, 0)))
        inv_xn = jnp.pad(inv_xn, ((0, pad), (0, 0)))
        label2d = jnp.pad(label2d, ((0, pad), (0, 0)), constant_values=-1)
    if Cp != C:
        weight = jnp.pad(weight, ((0, Cp - C), (0, 0)))

    kernel = functools.partial(
        _margin_cosine_kernel,
        s=float(scale), sm=float(scale) * float(m), eps=float(eps))

    out = pl.pallas_call(
        kernel,
        out_shape=jax.ShapeDtypeStruct((Bp, Cp), out_dtype),
        # Class tiles outer, batch tiles innermost: the weight block index only
        # depends on the slow axis, so each weight tile streams from HBM once.
        grid=(Cp // tc, Bp // tb),
        in_specs=[
            pl.BlockSpec((tb, D), lambda j, i: (i, 0)),   # x tile
            pl.BlockSpec((tc, D), lambda j, i: (j, 0)),   # weight tile (read 1x)
            pl.BlockSpec((tb, 1), lambda j, i: (i, 0)),   # 1 / ||x_b||
            pl.BlockSpec((tb, 1), lambda j, i: (i, 0)),   # labels
        ],
        out_specs=pl.BlockSpec((tb, tc), lambda j, i: (i, j)),
        scratch_shapes=[pltpu.VMEM((tc, D), mxu_dtype)],  # normalized weights
        compiler_params=pltpu.CompilerParams(
            dimension_semantics=("parallel", "arbitrary"),
            vmem_limit_bytes=vmem_limit,
        ),
    )(x, weight, inv_xn, label2d)

    if Bp != B or Cp != C:
        out = out[:B, :C]
    return out


def init_weight(key, in_features, out_features):
    # nn.init.xavier_uniform_ on a (out_features, in_features) tensor.
    bound = math.sqrt(6.0 / (in_features + out_features))
    return jax.random.uniform(
        key, (out_features, in_features), dtype=jnp.float32,
        minval=-bound, maxval=bound)


def reference(x, weight, label, scale=32.0, m=0.1, eps=1e-8):
    xf = x.astype(jnp.float32)
    wf = weight.astype(jnp.float32)
    ip = xf @ wf.T
    xn = jnp.linalg.norm(xf, axis=1)
    wn = jnp.linalg.norm(wf, axis=1)
    cosine = ip / jnp.maximum(jnp.outer(xn, wn), eps)
    one_hot = jax.nn.one_hot(label, weight.shape[0], dtype=jnp.float32)
    return scale * (cosine - one_hot * m)


if __name__ == "__main__":
    key = jax.random.PRNGKey(0)

    # Case 1: tiny single-block shapes (C padded 16 -> 128).
    # Case 2: exact-fit class tile, no padding, single grid step.
    # Case 3: forces grid (4, 3): B padded 44 -> 48, C padded 1000 -> 1024,
    #         weight-tile revisit across batch tiles + per-tile label offset.
    cases = (
        (8, 32, 16, 256, 4096),
        (24, 128, 384, 256, 4096),
        (44, 128, 1000, 16, 256),
    )
    for (batch, in_features, out_features, max_tb, max_tc) in cases:
        kx, kw, kl, key = jax.random.split(key, 4)
        x = jax.random.normal(kx, (batch, in_features), dtype=jnp.float32)
        weight = init_weight(kw, in_features, out_features)
        label = jax.random.randint(kl, (batch,), 0, out_features, dtype=jnp.int32)

        out = margin_cosine_product(x, weight, label, scale=32.0, m=0.1,
                                    max_tb=max_tb, max_tc=max_tc)
        out = jax.block_until_ready(out)

        ref = reference(x, weight, label, scale=32.0, m=0.1)
        assert out.shape == (batch, out_features)
        assert jnp.allclose(out, ref, atol=2e-3, rtol=2e-3), (
            f"mismatch vs reference at B={batch}, D={in_features}, C={out_features}")

    print("KERNEL_OK")
</pallas_src>

<mosaic_0001>
module attributes {stable_mosaic.version = 11 : i64} {
  func.func @_margin_cosine_kernel(%arg0: i32, %arg1: i32, %arg2: memref<8x32xf32, #tpu.memory_space<vmem>>, %arg3: memref<128x32xf32, #tpu.memory_space<vmem>>, %arg4: memref<8x1xf32, #tpu.memory_space<vmem>>, %arg5: memref<8x1xi32, #tpu.memory_space<vmem>>, %arg6: memref<8x128xf32, #tpu.memory_space<vmem>>, %arg7: memref<128x32xf32, #tpu.memory_space<vmem>>) attributes {dimension_semantics = [#tpu.dimension_semantics<parallel>, #tpu.dimension_semantics<arbitrary>], iteration_bounds = array<i64: 1, 1>, scalar_prefetch = 0 : i64, scratch_operands = 1 : i64, tpu.core_type = #tpu.core_type<tc>, window_params = [{transform_indices = @transform_0, window_bounds = array<i64: 8, 32>}, {transform_indices = @transform_1, window_bounds = array<i64: 128, 32>}, {transform_indices = @transform_2, window_bounds = array<i64: 8, 1>}, {transform_indices = @transform_3, window_bounds = array<i64: 8, 1>}, {transform_indices = @transform_4, window_bounds = array<i64: 8, 128>}]} {
    %c0_i32 = arith.constant 0 : i32
    %0 = arith.cmpi eq, %arg1, %c0_i32 : i32
    %1 = arith.extui %0 : i1 to i32
    %c0_i32_0 = arith.constant 0 : i32
    %2 = arith.cmpi ne, %1, %c0_i32_0 : i32
    scf.if %2 {
      %c0_11 = arith.constant 0 : index
      %c0_12 = arith.constant 0 : index
      %20 = vector.load %arg3[%c0_11, %c0_12] : memref<128x32xf32, #tpu.memory_space<vmem>>, vector<128x32xf32>
      %21 = arith.mulf %20, %20 : vector<128x32xf32>
      %cst_13 = arith.constant dense<0.000000e+00> : vector<128xf32>
      %22 = vector.multi_reduction <add>, %21, %cst_13 [1] : vector<128x32xf32> to vector<128xf32>
      %23 = vector.shape_cast %22 : vector<128xf32> to vector<128x1xf32>
      %cst_14 = arith.constant 9.99999993E-9 : f32
      %24 = vector.broadcast %cst_14 : f32 to vector<128x1xf32>
      %25 = arith.maximumf %23, %24 : vector<128x1xf32>
      %26 = math.rsqrt %25 : vector<128x1xf32>
      %cst_15 = arith.constant 3.200000e+01 : f32
      %27 = vector.broadcast %cst_15 : f32 to vector<128x1xf32>
      %28 = arith.mulf %27, %26 : vector<128x1xf32>
      %29 = vector.broadcast %28 : vector<128x1xf32> to vector<128x32xf32>
      %30 = arith.mulf %20, %29 : vector<128x32xf32>
      %c0_16 = arith.constant 0 : index
      %c0_17 = arith.constant 0 : index
      %31 = vector.load %arg7[%c0_16, %c0_17] : memref<128x32xf32, #tpu.memory_space<vmem>>, vector<128x32xf32>
      tpu.vector_store %arg7[%c0_16, %c0_17], %30 {strides = array<i32>} : memref<128x32xf32, #tpu.memory_space<vmem>>, vector<128x32xf32>,
    } else {
    }
    %c0 = arith.constant 0 : index
    %c0_1 = arith.constant 0 : index
    %3 = vector.load %arg2[%c0, %c0_1] : memref<8x32xf32, #tpu.memory_space<vmem>>, vector<8x32xf32>
    %c0_2 = arith.constant 0 : index
    %c0_3 = arith.constant 0 : index
    %4 = vector.load %arg4[%c0_2, %c0_3] : memref<8x1xf32, #tpu.memory_space<vmem>>, vector<8x1xf32>
    %5 = vector.broadcast %4 : vector<8x1xf32> to vector<8x32xf32>
    %6 = arith.mulf %3, %5 : vector<8x32xf32>
    %c0_4 = arith.constant 0 : index
    %c0_5 = arith.constant 0 : index
    %7 = vector.load %arg7[%c0_4, %c0_5] : memref<128x32xf32, #tpu.memory_space<vmem>>, vector<128x32xf32>
    %cst = arith.constant dense<0.000000e+00> : vector<8x128xf32>
    %8 = tpu.matmul %6, %7, %cst {dimension_numbers = #tpu.dot_dimension_numbers<[1], [1], [0], [0], [0, 0, 1, 0], [], []>} : vector<8x32xf32>, vector<128x32xf32>, vector<8x128xf32> -> vector<8x128xf32>
    %c0_6 = arith.constant 0 : index
    %c0_7 = arith.constant 0 : index
    %9 = vector.load %arg5[%c0_6, %c0_7] : memref<8x1xi32, #tpu.memory_space<vmem>>, vector<8x1xi32>
    %c128_i32 = arith.constant 128 : i32
    %10 = arith.muli %arg0, %c128_i32 : i32
    %11 = vector.broadcast %10 : i32 to vector<8x1xi32>
    %12 = arith.subi %9, %11 : vector<8x1xi32>
    %13 = tpu.iota {dimensions = array<i32: 1>} : vector<8x128xi32>
    %14 = vector.broadcast %12 : vector<8x1xi32> to vector<8x128xi32>
    %15 = arith.cmpi eq, %13, %14 : vector<8x128xi32>
    %cst_8 = arith.constant 3.200000e+00 : f32
    %16 = vector.broadcast %cst_8 : f32 to vector<8x128xf32>
    %17 = arith.subf %8, %16 : vector<8x128xf32>
    %18 = arith.select %15, %17, %8 : vector<8x128xi1>, vector<8x128xf32>
    %c0_9 = arith.constant 0 : index
    %c0_10 = arith.constant 0 : index
    %19 = vector.load %arg6[%c0_9, %c0_10] : memref<8x128xf32, #tpu.memory_space<vmem>>, vector<8x128xf32>
    tpu.vector_store %arg6[%c0_9, %c0_10], %18 {strides = array<i32>} : memref<8x128xf32, #tpu.memory_space<vmem>>, vector<8x128xf32>,
    return
  }
  func.func @transform_0(%arg0: i32, %arg1: i32) -> (i32, i32) {
    %c0_i32 = arith.constant 0 : i32
    %c0_i32_0 = arith.constant 0 : i32
    return %arg1, %c0_i32 : i32, i32
  }
  func.func @transform_1(%arg0: i32, %arg1: i32) -> (i32, i32) {
    %c0_i32 = arith.constant 0 : i32
    %c0_i32_0 = arith.constant 0 : i32
    return %arg0, %c0_i32 : i32, i32
  }
  func.func @transform_2(%arg0: i32, %arg1: i32) -> (i32, i32) {
    %c0_i32 = arith.constant 0 : i32
    %c0_i32_0 = arith.constant 0 : i32
    return %arg1, %c0_i32 : i32, i32
  }
  func.func @transform_3(%arg0: i32, %arg1: i32) -> (i32, i32) {
    %c0_i32 = arith.constant 0 : i32
    %c0_i32_0 = arith.constant 0 : i32
    return %arg1, %c0_i32 : i32, i32
  }
  func.func @transform_4(%arg0: i32, %arg1: i32) -> (i32, i32) {
    %c0_i32 = arith.constant 0 : i32
    return %arg1, %arg0 : i32, i32
  }
}

</mosaic_0001>

<bundles_post_ra>
// kernel: tpu_custom_call.1
= control target key start
LH: loop header
LB: loop body
LE: loop exit
PB: predicated region body
PF: predicated region fallthrough
CT: control target
= control target key end

     0   :  { %vm54_vm0 = vcmask 261120   ;;  %v486_v7 = vmov 0   ;;  %s721_s0 = inlined_call_operand.vmem [shape: f32[8,32], index: 0, kind: input, shape index: {}]   ;;  %s722_s1 = inlined_call_operand.vmem [shape: f32[128,32], index: 1, kind: input, shape index: {}]   ;;  %s723_s2 = inlined_call_operand.vmem [shape: f32[8,1], index: 2, kind: input, shape index: {}]   ;;  %s724_s3 = inlined_call_operand.vmem [shape: s32[8,1], index: 3, kind: input, shape index: {}]   ;;  %s725_s4 = inlined_call_operand.hbm [shape: f32[8,128], index: 4, kind: output, shape index: {}]  }
   0x1   :  { %v518_v0 = vld [vmem:[%s722_s1 + $0x78] sm:$0xff]  ;;  %v523_v1 = vld [vmem:[%s722_s1 + $0x70] sm:$0xff]  ;;  %v528_v2 = vld [vmem:[%s722_s1 + $0x68] sm:$0xff]  ;;  %430 = vset.pattern.permute.xlu0 %v486_v7  ;;  %431 = vset.pattern.permute.xlu1 %v486_v7 }
   0x2   :  { %v53_v3 = vmul.f32 %v518_v0, %v518_v0  ;;  %v52_v4 = vmul.f32 %v523_v1, %v523_v1  ;;  %v51_v5 = vmul.f32 %v528_v2, %v528_v2  ;;  %v539_v6 = vld [vmem:[%s722_s1 + $0x60] sm:$0xff]  ;;  %v546_v9 = vld [vmem:[%s722_s1 + $0x58] sm:$0xff]  ;;  %v551_v10 = vld [vmem:[%s722_s1 + $0x50] sm:$0xff] }
   0x3   :  { %v50_v8 = vmul.f32 %v539_v6, %v539_v6  ;;  %v49_v15 = vmul.f32 %v546_v9, %v546_v9  ;;  %v48_v16 = vmul.f32 %v551_v10, %v551_v10 }
   0x4   :  { %v100_v11 = vsel %vm54_vm0, %v53_v3, 0.0  ;;  %v94_v12 = vsel %vm54_vm0, %v51_v5, 0.0  ;;  %v97_v13 = vsel %vm54_vm0, %v52_v4, 0.0 }
   0x5   :  { %101 = vadd.xlane.f32.xlu0 %v100_v11  ;;  %95 = vadd.xlane.f32.xlu1 %v94_v12  ;;  %v91_v14 = vsel %vm54_vm0, %v50_v8, 0.0 }
   0x6   :  { %9 = vsyncpa [#allocation4], 0  ;;  %v564_v17 = vld [vmem:[%s722_s1 + $0x48] sm:$0xff]  ;;  %v569_v18 = vld [vmem:[%s722_s1 + $0x40] sm:$0xff]  ;;  %v88_v19 = vsel %vm54_vm0, %v49_v15, 0.0  ;;  %v85_v20 = vsel %vm54_vm0, %v48_v16, 0.0 }
   0x7   :  { %v47_v21 = vmul.f32 %v564_v17, %v564_v17  ;;  %v46_v22 = vmul.f32 %v569_v18, %v569_v18  ;;  %v580_v23 = vld [vmem:[%s722_s1 + $0x38] sm:$0xff]  ;;  %v585_v24 = vld [vmem:[%s722_s1 + $0x30] sm:$0xff]  ;;  %v596_v29 = vld [vmem:[%s722_s1 + $0x28] sm:$0xff]  ;;  %v487_v49 = vmov 0.0   ;;  %vm488_vm1 = vmmov 0   ;;  %s489_s24 = smov [#allocation3]  }
   0x8   :  { %v45_v27 = vmul.f32 %v580_v23, %v580_v23  ;;  %v44_v28 = vmul.f32 %v585_v24, %v585_v24  ;;  %v601_v30 = vld [vmem:[%s722_s1 + $0x20] sm:$0xff]  ;;  %v43_v33 = vmul.f32 %v596_v29, %v596_v29  ;;  %v612_v35 = vld [vmem:[%s722_s1 + $0x18] sm:$0xff]  ;;  %v617_v36 = vld [vmem:[%s722_s1 + $0x10] sm:$0xff]  ;;  %391 = vmatprep.subr.mxu0 %v487_v49  ;;  %423 = vmatprep.mubr.msk.f32.mxu0 %vm488_vm1, %v487_v49  ;;  %s348_s25 = sshll.u32 %s489_s24, 4  ;;  %s349_s25 = int_to_ptr.vmem [resolvable:$true] %s348_s25 }
   0x9   :  { %98 = vadd.xlane.f32.xlu0 %v97_v13  ;;  %92 = vadd.xlane.f32.xlu1 %v91_v14  ;;  %v82_v25 = vsel %vm54_vm0, %v47_v21, 0.0  ;;  %v79_v26 = vsel %vm54_vm0, %v46_v22, 0.0  ;;  %v42_v34 = vmul.f32 %v601_v30, %v601_v30  ;;  %v41_v39 = vmul.f32 %v612_v35, %v612_v35  ;;  %v628_v41 = vld [vmem:[%s722_s1 + $0x8] sm:$0xff]  ;;  %v633_v42 = vld [vmem:[%s722_s1] sm:$0xff]  ;;  %p469_p1 = scmp.lt.s32.totalorder %s349_s25, %s349_s25 }
   0xa   :  { %v76_v31 = vsel %vm54_vm0, %v45_v27, 0.0  ;;  %v73_v32 = vsel %vm54_vm0, %v44_v28, 0.0  ;;  %v70_v37 = vsel %vm54_vm0, %v43_v33, 0.0  ;;  %v40_v40 = vmul.f32 %v617_v36, %v617_v36  ;;  %v184_v50 = vld [vmem:[%s723_s2] sm:$0xff] }
   0xb   :  { %v67_v38 = vsel %vm54_vm0, %v42_v34, 0.0  ;;  %v64_v43 = vsel %vm54_vm0, %v41_v39, 0.0  ;;  %v39_v45 = vmul.f32 %v628_v41, %v628_v41  ;;  %v38_v46 = vmul.f32 %v633_v42, %v633_v42  ;;  %v329_v51 = vld [vmem:[%s724_s3] sm:$0xff] }
   0xc   :  { %v61_v44 = vsel %vm54_vm0, %v40_v40, 0.0 }
   0xd   :  { %89 = vadd.xlane.f32.xlu0 %v88_v19  ;;  %86 = vadd.xlane.f32.xlu1 %v85_v20  ;;  %v58_v47 = vsel %vm54_vm0, %v39_v45, 0.0  ;;  %v55_v48 = vsel %vm54_vm0, %v38_v46, 0.0 }
  0x11   :  { %83 = vadd.xlane.f32.xlu0 %v82_v25  ;;  %80 = vadd.xlane.f32.xlu1 %v79_v26 }
  0x15   :  { %77 = vadd.xlane.f32.xlu0 %v76_v31  ;;  %74 = vadd.xlane.f32.xlu1 %v73_v32 }
  0x19   :  { %71 = vadd.xlane.f32.xlu0 %v70_v37  ;;  %68 = vadd.xlane.f32.xlu1 %v67_v38 }
  0x1d   :  { %65 = vadd.xlane.f32.xlu0 %v64_v43  ;;  %62 = vadd.xlane.f32.xlu1 %v61_v44 }
  0x21   :  { %59 = vadd.xlane.f32.xlu0 %v58_v47  ;;  %56 = vadd.xlane.f32.xlu1 %v55_v48 }
  0x32   :  { %336 = vperm.xlu1 %431, %v329_v51  }
  0x37   :  { %187 = vperm.xlu0 %430, %v184_v50  }
  0x8e   :  { %v102_v52 = vpop.xlane.xlu0 %101  ;;  %v96_v53 = vpop.xlane.xlu1 %95 }
  0x8f   :  { %v118_v54 = vmax.f32 %v102_v52, 1e-08  ;;  %v116_v55 = vmax.f32 %v96_v53, 1e-08 }
  0x91   :  { %432 = vrsqrt.f32 %v118_v54 }
  0x92   :  { %v99_v56 = vpop.xlane.xlu0 %98  ;;  %434 = vrsqrt.f32 %v116_v55  ;;  %v93_v57 = vpop.xlane.xlu1 %92 }
  0x93   :  { %v117_v58 = vmax.f32 %v99_v56, 1e-08  ;;  %v115_v59 = vmax.f32 %v93_v57, 1e-08 }
  0x95   :  { %436 = vrsqrt.f32 %v117_v58 }
  0x96   :  { %438 = vrsqrt.f32 %v115_v59  ;;  %v90_v60 = vpop.xlane.xlu0 %89  ;;  %v87_v61 = vpop.xlane.xlu1 %86 }
  0x97   :  { %v114_v62 = vmax.f32 %v90_v60, 1e-08  ;;  %v113_v63 = vmax.f32 %v87_v61, 1e-08 }
  0x99   :  { %440 = vrsqrt.f32 %v114_v62 }
  0x9a   :  { %442 = vrsqrt.f32 %v113_v63  ;;  %v84_v3 = vpop.xlane.xlu0 %83  ;;  %v81_v4 = vpop.xlane.xlu1 %80 }
  0x9b   :  { %v112_v5 = vmax.f32 %v84_v3, 1e-08  ;;  %v111_v7 = vmax.f32 %v81_v4, 1e-08 }
  0x9d   :  { %444 = vrsqrt.f32 %v112_v5 }
  0x9e   :  { %v433_v8 = vpop.eup %432  ;;  %446 = vrsqrt.f32 %v111_v7  ;;  %v78_v11 = vpop.xlane.xlu0 %77 }
  0x9f   :  { %v75_v12 = vpop.xlane.xlu1 %74  ;;  %v435_v13 = vpop.eup %434  ;;  %v150_v14 = vmul.f32 32.0, %v433_v8  ;;  %v110_v15 = vmax.f32 %v78_v11, 1e-08 }
  0xa0   :  { %v109_v16 = vmax.f32 %v75_v12, 1e-08  ;;  %v148_v19 = vmul.f32 32.0, %v435_v13 }
  0xa1   :  { %v166_v20 = vmul.f32 %v150_v14, %v518_v0  ;;  %448 = vrsqrt.f32 %v110_v15 }
  0xa2   :  { %v437_v21 = vpop.eup %436  ;;  %v164_v22 = vmul.f32 %v148_v19, %v528_v2  ;;  %450 = vrsqrt.f32 %v109_v16  ;;  %v72_v25 = vpop.xlane.xlu0 %71 }
  0xa3   :  { %v69_v26 = vpop.xlane.xlu1 %68  ;;  %v439_v27 = vpop.eup %438  ;;  %182 = vst.msk [vmem:[#allocation2 + $0x78] sm:$0xff] %vm54_vm0, %v166_v20  ;;  %v149_v28 = vmul.f32 32.0, %v437_v21  ;;  %v108_v31 = vmax.f32 %v72_v25, 1e-08 }
  0xa4   :  { %v107_v32 = vmax.f32 %v69_v26, 1e-08  ;;  %180 = vst.msk [vmem:[#allocation2 + $0x68] sm:$0xff] %vm54_vm0, %v164_v22  ;;  %v147_v33 = vmul.f32 32.0, %v439_v27 }
  0xa5   :  { %v165_v34 = vmul.f32 %v149_v28, %v523_v1  ;;  %452 = vrsqrt.f32 %v108_v31 }
  0xa6   :  { %v441_v0 = vpop.eup %440  ;;  %v163_v37 = vmul.f32 %v147_v33, %v539_v6  ;;  %454 = vrsqrt.f32 %v107_v32  ;;  %v66_v2 = vpop.xlane.xlu0 %65  ;;  %v183_v32 = vld [vmem:[%s721_s0] sm:$0xff]  ;;  %s464_s0 = scalar_lea.vmem %s349_s25, 128 }
  0xa7   :  { %v63_v38 = vpop.xlane.xlu1 %62  ;;  %v443_v39 = vpop.eup %442  ;;  %181 = vst.msk [vmem:[#allocation2 + $0x70] sm:$0xff] %vm54_vm0, %v165_v34  ;;  %v146_v40 = vmul.f32 32.0, %v441_v0  ;;  %v106_v43 = vmax.f32 %v66_v2, 1e-08  ;;  %p465_p0 = scmp.ne.s32.totalorder %s349_s25, %s464_s0  ;;  %p470_p2 = scmp.lt.s32.totalorder %s464_s0, %s464_s0 }
  0xa8   :  { %v105_v44 = vmax.f32 %v63_v38, 1e-08  ;;  %179 = vst.msk [vmem:[#allocation2 + $0x60] sm:$0xff] %vm54_vm0, %v163_v37  ;;  %v145_v45 = vmul.f32 32.0, %v443_v39  ;;  %v333_v37 = vlaneseq }
  0xa9   :  { %v162_v46 = vmul.f32 %v146_v40, %v546_v9  ;;  %456 = vrsqrt.f32 %v106_v43  ;;  %p471_p3 = por %p470_p2, %p469_p1 }
  0xaa   :  { %v445_v1 = vpop.eup %444  ;;  %v161_v47 = vmul.f32 %v145_v45, %v551_v10  ;;  %v206_v48 = vld [vmem:[#allocation2 + $0x78] sm:$0xff]  ;;  %458 = vrsqrt.f32 %v105_v44  ;;  %v60_v6 = vpop.xlane.xlu0 %59  ;;  %v334_v2 = vand.u32 127, %v333_v37 }
  0xab   :  { %v57_v50 = vpop.xlane.xlu1 %56  ;;  %v447_v51 = vpop.eup %446  ;;  %178 = vst.msk [vmem:[#allocation2 + $0x58] sm:$0xff] %vm54_vm0, %v162_v46  ;;  %v144_v52 = vmul.f32 32.0, %v445_v1  ;;  %392 = vmatpush3.xpose.msk.msra.mxu0 %vm54_vm0, %v206_v48  ;;  %v104_v53 = vmax.f32 %v60_v6, 1e-08  ;;  %v204_v61 = vld [vmem:[#allocation2 + $0x68] sm:$0xff]  ;;  %p472_p4 = pnand %p471_p3, %p465_p0 }
  0xac   :  { %v103_v54 = vmax.f32 %v57_v50, 1e-08  ;;  %177 = vst.msk [vmem:[#allocation2 + $0x50] sm:$0xff] %vm54_vm0, %v161_v47  ;;  %v143_v55 = vmul.f32 32.0, %v447_v51  ;;  %393 = vmatprep.subr.mxu0 %v487_v49 }
  0xad   :  { %v160_v9 = vmul.f32 %v144_v52, %v564_v17  ;;  %460 = vrsqrt.f32 %v104_v53 }
  0xae   :  { %v449_v10 = vpop.eup %448  ;;  %v159_v56 = vmul.f32 %v143_v55, %v569_v18  ;;  %v205_v57 = vld [vmem:[#allocation2 + $0x70] sm:$0xff]  ;;  %462 = vrsqrt.f32 %v103_v54 }
  0xaf   :  { %v451_v58 = vpop.eup %450  ;;  %176 = vst.msk [vmem:[#allocation2 + $0x48] sm:$0xff] %vm54_vm0, %v160_v9  ;;  %v142_v59 = vmul.f32 32.0, %v449_v10  ;;  %394 = vmatpush3.xpose.msk.msra.mxu0 %vm54_vm0, %v205_v57  ;;  %v203_v4 = vld [vmem:[#allocation2 + $0x60] sm:$0xff]  ;;  %v337_v38 = vpop.permute.xlu1 %336 }
  0xb0   :  { %175 = vst.msk [vmem:[#allocation2 + $0x40] sm:$0xff] %vm54_vm0, %v159_v56  ;;  %395 = vmatprep.subr.mxu0 %v487_v49  ;;  %v141_v60 = vmul.f32 32.0, %v451_v58  ;;  %vm338_vm2 = vcmp.eq.s32.totalorder %v334_v2, %v337_v38 }
  0xb1   :  { %v158_v17 = vmul.f32 %v142_v59, %v580_v23 }
  0xb2   :  { %v453_v62 = vpop.eup %452  ;;  %v157_v63 = vmul.f32 %v141_v60, %v585_v24  ;;  %v202_v12 = vld [vmem:[#allocation2 + $0x58] sm:$0xff]  ;;  %v188_v33 = vpop.permute.xlu0 %187 }
  0xb3   :  { %v455_v18 = vpop.eup %454  ;;  %174 = vst.msk [vmem:[#allocation2 + $0x38] sm:$0xff] %vm54_vm0, %v158_v17  ;;  %396 = vmatpush3.xpose.msk.msra.mxu0 %vm54_vm0, %v204_v61  ;;  %v140_v3 = vmul.f32 32.0, %v453_v62  ;;  %v201_v19 = vld [vmem:[#allocation2 + $0x50] sm:$0xff]  ;;  %v190_v0 = vmul.f32 %v188_v33, %v183_v32 }
  0xb4   :  { %173 = vst.msk [vmem:[#allocation2 + $0x30] sm:$0xff] %vm54_vm0, %v157_v63  ;;  %397 = vmatprep.subr.mxu0 %v487_v49  ;;  %v139_v5 = vmul.f32 32.0, %v455_v18 }
  0xb5   :  { %v156_v7 = vmul.f32 %v140_v3, %v596_v29 }
  0xb6   :  { %v457_v8 = vpop.eup %456  ;;  %v155_v23 = vmul.f32 %v139_v5, %v601_v30 }
  0xb7   :  { %v459_v11 = vpop.eup %458  ;;  %172 = vst.msk [vmem:[#allocation2 + $0x28] sm:$0xff] %vm54_vm0, %v156_v7  ;;  %398 = vmatpush3.xpose.msk.msra.mxu0 %vm54_vm0, %v203_v4  ;;  %v138_v24 = vmul.f32 32.0, %v457_v8 }
  0xb8   :  { %399 = vmatprep.subr.mxu0 %v487_v49  ;;  %171 = vst.msk [vmem:[#allocation2 + $0x20] sm:$0xff] %vm54_vm0, %v155_v23  ;;  %v137_v13 = vmul.f32 32.0, %v459_v11 }
  0xb9   :  { %v154_v14 = vmul.f32 %v138_v24, %v612_v35  ;;  %v200_v35 = vld [vmem:[#allocation2 + $0x48] sm:$0xff] }
  0xba   :  { %v461_v15 = vpop.eup %460  ;;  %v153_v29 = vmul.f32 %v137_v13, %v617_v36  ;;  %v199_v36 = vld [vmem:[#allocation2 + $0x40] sm:$0xff] }
  0xbb   :  { %v463_v16 = vpop.eup %462  ;;  %400 = vmatpush3.xpose.msk.msra.mxu0 %vm54_vm0, %v202_v12  ;;  %170 = vst.msk [vmem:[#allocation2 + $0x18] sm:$0xff] %vm54_vm0, %v154_v14  ;;  %v136_v30 = vmul.f32 32.0, %v461_v15 }
  0xbc   :  { %401 = vmatprep.subr.mxu0 %v487_v49  ;;  %169 = vst.msk [vmem:[#allocation2 + $0x10] sm:$0xff] %vm54_vm0, %v153_v29  ;;  %v135_v20 = vmul.f32 32.0, %v463_v16 }
  0xbd   :  { %v152_v21 = vmul.f32 %v136_v30, %v628_v41  ;;  %v198_v41 = vld [vmem:[#allocation2 + $0x38] sm:$0xff] }
  0xbe   :  { %v151_v22 = vmul.f32 %v135_v20, %v633_v42  ;;  %v197_v42 = vld [vmem:[#allocation2 + $0x30] sm:$0xff]  ;;  %v196_v25 = vld [vmem:[#allocation2 + $0x28] sm:$0xff] }
  0xbf   :  { %402 = vmatpush3.xpose.msk.msra.mxu0 %vm54_vm0, %v201_v19  ;;  %168 = vst.msk [vmem:[#allocation2 + $0x8] sm:$0xff] %vm54_vm0, %v152_v21  ;;  %v195_v26 = vld [vmem:[#allocation2 + $0x20] sm:$0xff] }
  0xc0   :  { %403 = vmatprep.subr.mxu0 %v487_v49  ;;  %167 = vst.msk [vmem:[#allocation2] sm:$0xff] %vm54_vm0, %v151_v22 }
  0xc2   :  { %v194_v27 = vld [vmem:[#allocation2 + $0x18] sm:$0xff] }
  0xc3   :  { %404 = vmatpush3.xpose.msk.msra.mxu0 %vm54_vm0, %v200_v35  ;;  %v193_v28 = vld [vmem:[#allocation2 + $0x10] sm:$0xff] }
  0xc4   :  { %405 = vmatprep.subr.mxu0 %v487_v49 }
  0xc6   :  { %v192_v31 = vld [vmem:[#allocation2 + $0x8] sm:$0xff] }
  0xc7   :  { %406 = vmatpush3.xpose.msk.msra.mxu0 %vm54_vm0, %v199_v36  ;;  %v191_v34 = vld [vmem:[#allocation2] sm:$0xff] }
  0xc8   :  { %407 = vmatprep.subr.mxu0 %v487_v49 }
  0xcb   :  { %408 = vmatpush3.xpose.msk.msra.mxu0 %vm54_vm0, %v198_v41 }
  0xcc   :  { %409 = vmatprep.subr.mxu0 %v487_v49 }
  0xcf   :  { %410 = vmatpush3.xpose.msk.msra.mxu0 %vm54_vm0, %v197_v42 }
  0xd0   :  { %411 = vmatprep.subr.mxu0 %v487_v49 }
  0xd3   :  { %412 = vmatpush3.xpose.msk.msra.mxu0 %vm54_vm0, %v196_v25 }
  0xd4   :  { %413 = vmatprep.subr.mxu0 %v487_v49 }
  0xd7   :  { %414 = vmatpush3.xpose.msk.msra.mxu0 %vm54_vm0, %v195_v26 }
  0xd8   :  { %415 = vmatprep.subr.mxu0 %v487_v49 }
  0xdb   :  { %416 = vmatpush3.xpose.msk.msra.mxu0 %vm54_vm0, %v194_v27 }
  0xdc   :  { %417 = vmatprep.subr.mxu0 %v487_v49 }
  0xdf   :  { %418 = vmatpush3.xpose.msk.msra.mxu0 %vm54_vm0, %v193_v28 }
  0xe0   :  { %419 = vmatprep.subr.mxu0 %v487_v49 }
  0xe3   :  { %420 = vmatpush3.xpose.msk.msra.mxu0 %vm54_vm0, %v192_v31 }
  0xe4   :  { %421 = vmatprep.subr.mxu0 %v487_v49 }
  0xe7   :  { %422 = vmatpush3.xpose.msk.msra.mxu0 %vm54_vm0, %v191_v34 }
  0xea   :  { %424 = vmatmul.mubr.msk.f32.vlgmr.msra.gmra.mxu0 %vm54_vm0, %v190_v0 }
 0x1aa   :  { %v325_v39 = vpop.f32.mrf.mxu0 }
 0x1ab   :  { %v373_v40 = vadd.f32 -3.2, %v325_v39 }
 0x1ac   :  { %v425_v43 = vpop.f32.mrf.mxu0 }
 0x1ad   :  { %v340_v44 = vsel %vm338_vm2, %v373_v40, %v325_v39 }
 0x1ae   :  { %341 = vst [vmem:[#allocation3] sm:$0xff] %v340_v44 }
 0x1af   :  { %475 = shalt.err (!%p472_p4)
}
 0x1b0   :  { %351 = dma.vmem_to_hbm [thread:$0]  %s349_s25, 128, %s725_s4, [#allocation4]  }
 0x1b1   :  { %484 = dma.done.wait [#allocation4], 128  }
 0x1b2   :  { %485 = vsyncadd [#allocation4], 4294967168 }
 0x1b3   :  { %355 = vsyncpa [#allocation4], 1 }

</bundles_post_ra>
